<compile_context>
chip_gen: v7x
topology: tpu7x:2x2x1
jax: 0.10.0
libtpu: 0.0.40
codegen_flags: <defaults>
</compile_context>

<pallas_src>
import functools

import jax
import jax.numpy as jnp
from jax.experimental import pallas as pl
from jax.experimental.pallas import tpu as pltpu


def _round_up(x, m):
    return (x + m - 1) // m * m


# ----------------------------- Pallas kernel ------------------------------- #

def _upconv_kernel(x_ref, w_ref, c_ref, o_ref, *, cin, wp, l_out):
    """One (batch, row-tile) block of the transposed conv.

    x_ref: (1, 1, Cin, L_in)     bf16 halo'd input tile, padded spatial
                                 flattened into lanes (row stride = Wp).
    w_ref: (4*Cout, 9*Cin)       bf16 folded weight (rows = phase-major
                                 (a,b,co), cols = tap-major (dh,dw,ci)),
                                 eval-mode BN scale folded in.
    c_ref: (4*Cout, 1)           f32 folded conv-bias*scale + BN shift.
    o_ref: (1, 1, 4*Cout, L_out) bf16, L_out = round_up(TH*Wp, 128) lanes.
    """
    x = x_ref[0, 0]                                   # (Cin, L_in) bf16
    # In-kernel im2col: the 9 taps are static lane slices of the halo'd tile,
    # stacked along sublanes into one (9*Cin, L_out) slab -> a single MXU dot
    # with K = 9*Cin (instead of 9 separate K=Cin dots + 9 accumulator passes).
    slab = jnp.concatenate(
        [x[:, dh * wp + dw: dh * wp + dw + l_out]
         for dh in range(3) for dw in range(3)],
        axis=0)                                       # (9*Cin, L_out) bf16
    acc = jnp.dot(w_ref[...], slab,
                  preferred_element_type=jnp.float32)  # (4*Cout, L_out) f32
    acc = acc + c_ref[...]                            # folded bias*scale + shift
    o_ref[0, 0] = jnp.maximum(acc, 0.0).astype(o_ref.dtype)   # f32 ReLU -> bf16


# ------------------------------ JAX glue ------------------------------------ #

def _block_vmem_bytes(th, wp, cin, cout):
    """Approximate per-step VMEM working set (double-buffered I/O + scratch)."""
    l_out = _round_up(th * wp, 128)
    rows = -(-(2 * wp + 2 + l_out) // wp)
    l_in = rows * wp
    b = 0
    b += 2 * cin * l_in * 2              # double-buffered bf16 input block
    b += 2 * 4 * cout * l_out * 2        # double-buffered bf16 output block
    b += 9 * cin * l_out * 2             # in-kernel im2col slab (bf16)
    b += 4 * cout * l_out * 4            # f32 accumulator
    b += 4 * cout * 9 * cin * 2 + 4 * cout * 4      # weights + shift
    return b


def _pick_tile_rows(n, h, w, cin, cout, vmem_budget=12 << 20):
    """Largest row-tile (divisor of H) whose working set fits the VMEM budget.
    Prefers >= 2 row-tiles when batch == 1 so both v7x TensorCores get work."""
    wp = w + 2
    divisors = [d for d in range(h, 0, -1) if h % d == 0]
    fitting = [d for d in divisors if _block_vmem_bytes(d, wp, cin, cout)
               <= vmem_budget]
    if not fitting:
        fitting = [1]
    if n < 2:
        multi = [d for d in fitting if h // d >= 2]
        if multi:
            return multi[0]
    return fitting[0]


def _fold_transposed_weight(w, bias, scale, shift):
    """Build the (4*Cout, 9*Cin) phase/tap matrix of the k=4,s=2,p=1 transposed
    conv with the eval-mode BN scale folded in, plus the (4*Cout, 1) shift.

    Phase (a, b) of the 2x2 pixel shuffle at input position (i, j) reads the
    3x3 zero-padded window xp[i:i+3, j:j+3]; tap (dh, dw) of that window uses
    kernel element (kh, kw) with dh->kh = {0:3,1:1} (a=0) / {1:2,2:0} (a=1),
    and identically for dw->kw with b.
    """
    cin, cout = w.shape[0], w.shape[1]
    wf = w * scale[None, :, None, None]                 # fold BN scale
    w4 = jnp.transpose(wf, (2, 3, 0, 1))                # (kh, kw, Cin, Cout)
    wc = jnp.zeros((9 * cin, 4 * cout), jnp.float32)
    for a in range(2):
        row_taps = {0: 3, 1: 1} if a == 0 else {1: 2, 2: 0}      # dh -> kh
        for b in range(2):
            col_taps = {0: 3, 1: 1} if b == 0 else {1: 2, 2: 0}  # dw -> kw
            for dh, kh in row_taps.items():
                for dw, kw in col_taps.items():
                    r0 = (dh * 3 + dw) * cin
                    c0 = (a * 2 + b) * cout
                    wc = wc.at[r0:r0 + cin, c0:c0 + cout].set(w4[kh, kw])
    w_eff = jnp.transpose(wc).astype(jnp.bfloat16)      # (4*Cout, 9*Cin)
    c_eff = jnp.tile(bias * scale + shift, 4).reshape(4 * cout, 1)
    return w_eff, c_eff.astype(jnp.float32)


def upconv_layer(x, params, *, tile_rows=None):
    """UpConvLayer forward: relu(bn(conv_transpose2d(x, k=4, s=2, p=1)))."""
    w, bias, scale, shift = params

    if x.ndim == 5:                       # TemporallySharedBlock.smart_forward
        b, t = x.shape[:2]
        out = upconv_layer(x.reshape((b * t,) + x.shape[2:]), params,
                           tile_rows=tile_rows)
        return out.reshape((b, t) + out.shape[1:])

    n, cin, h, wdt = x.shape
    cout = w.shape[1]
    wp = wdt + 2                          # padded width (left 1, right 1)
    th = (tile_rows if tile_rows is not None
          else _pick_tile_rows(n, h, wdt, cin, cout))
    assert h % th == 0, (h, th)
    ni = h // th
    l_data = th * wp                      # real output positions in lanes
    l_out = _round_up(l_data, 128)        # lane-dense (unmasked) store extent
    rows_needed = -(-(2 * wp + 2 + l_out) // wp)   # halo + slack rows per tile
    l_in = rows_needed * wp

    w_eff, c_eff = _fold_transposed_weight(w, bias, scale, shift)

    # bf16 input stream; zero pad = ConvTranspose2d boundary behaviour.
    xb = x.astype(jnp.bfloat16)
    pad_bottom = (ni - 1) * th + rows_needed - h - 1
    xp = jnp.pad(xb, ((0, 0), (0, 0), (1, pad_bottom), (1, 1)))
    # Halo'd row-tiles, padded spatial flattened into the lane dimension.
    # With th == h (whole image per step, the usual case) this is duplication-free.
    xblk = jnp.stack(
        [xp[:, :, i * th:i * th + rows_needed, :] for i in range(ni)], axis=1)
    xblk = xblk.reshape(n, ni, cin, l_in)

    kern = functools.partial(_upconv_kernel, cin=cin, wp=wp, l_out=l_out)
    out = pl.pallas_call(
        kern,
        out_shape=jax.ShapeDtypeStruct((n, ni, 4 * cout, l_out), jnp.bfloat16),
        grid=(n, ni),
        in_specs=[
            pl.BlockSpec((1, 1, cin, l_in), lambda nb, ib: (nb, ib, 0, 0)),
            pl.BlockSpec((4 * cout, 9 * cin), lambda nb, ib: (0, 0)),
            pl.BlockSpec((4 * cout, 1), lambda nb, ib: (0, 0)),
        ],
        out_specs=pl.BlockSpec((1, 1, 4 * cout, l_out),
                               lambda nb, ib: (nb, ib, 0, 0)),
        compiler_params=pltpu.CompilerParams(
            dimension_semantics=("parallel", "parallel"),
            vmem_limit_bytes=32 << 20),
        cost_estimate=pl.CostEstimate(
            flops=2 * n * ni * (4 * cout) * (9 * cin) * l_out,
            transcendentals=0,
            bytes_accessed=(xblk.size * 2 + n * ni * 4 * cout * l_out * 2
                            + w_eff.size * 2 + c_eff.size * 4)),
    )(xblk, w_eff, c_eff)

    # 2x2 pixel de-shuffle on the bf16 output (half the traffic of f32):
    # (N, nI, a, b, Cout, TH, Wp) -> (N, Cout, 2H, 2W); drop junk lanes/cols.
    out = out[..., :l_data].reshape(n, ni, 2, 2, cout, th, wp)[..., :wdt]
    out = jnp.transpose(out, (0, 4, 1, 5, 2, 6, 3))   # N, Cout, nI, TH, a, W, b
    return out.reshape(n, cout, 2 * h, 2 * wdt)


# ------------------------------ reference ----------------------------------- #

def ref_upconv_layer(x, params):
    """Pure-XLA reference: ConvTranspose2d(k=4,s=2,p=1) + folded BN + ReLU.
    Uses the same bf16 rounding of inputs/folded weights as the kernel (f32
    accumulation) so the comparison isolates the kernel's indexing/math."""
    w, bias, scale, shift = params
    wf = (w * scale[None, :, None, None]).astype(jnp.bfloat16).astype(jnp.float32)
    cf = bias * scale + shift
    xb = x.astype(jnp.bfloat16).astype(jnp.float32)
    x_nhwc = jnp.transpose(xb, (0, 2, 3, 1))
    w_hwio = jnp.transpose(wf, (2, 3, 0, 1))[::-1, ::-1]   # flipped taps
    y = jax.lax.conv_general_dilated(
        x_nhwc, w_hwio, window_strides=(1, 1),
        padding=[(2, 2), (2, 2)], lhs_dilation=(2, 2),
        dimension_numbers=("NHWC", "HWIO", "NHWC"),
        preferred_element_type=jnp.float32)
    y = jnp.maximum(y + cf, 0.0)
    return jnp.transpose(y, (0, 3, 1, 2))


# --------------------------------- main -------------------------------------- #

if __name__ == "__main__":
    n, cin, cout, h, w_sp = 2, 8, 8, 16, 16      # UpConvLayer(n_kernels=[8, 8])

    root = jax.random.PRNGKey(0)
    kx, kw, kb, kg, kbt, km, kv = jax.random.split(root, 7)

    x = jax.random.normal(kx, (n, cin, h, w_sp), jnp.float32)      # NCHW
    wt = jax.random.normal(kw, (cin, cout, 4, 4), jnp.float32) / (cin * 16) ** 0.5
    bias = 0.1 * jax.random.normal(kb, (cout,), jnp.float32)
    gamma = 1.0 + 0.1 * jax.random.normal(kg, (cout,), jnp.float32)
    beta = 0.1 * jax.random.normal(kbt, (cout,), jnp.float32)
    rmean = 0.1 * jax.random.normal(km, (cout,), jnp.float32)
    rvar = 0.9 + 0.1 * jnp.abs(jax.random.normal(kv, (cout,), jnp.float32))
    eps = 1e-5
    scale = gamma / jnp.sqrt(rvar + eps)         # eval-mode BN folded
    shift = beta - scale * rmean
    params = (wt, bias, scale, shift)

    fwd = jax.jit(upconv_layer)
    out = jax.block_until_ready(fwd(x, params))
    ref = jax.block_until_ready(ref_upconv_layer(x, params))

    assert out.shape == (n, cout, 2 * h, 2 * w_sp), out.shape
    # Kernel output is bf16 (per perf review); tolerance covers bf16 rounding.
    max_err = float(jnp.max(jnp.abs(out.astype(jnp.float32) - ref)))
    assert max_err < 2e-2, f"mismatch vs reference: {max_err}"

    # smart_forward path: 5-D (b, t, c, h, w) is flattened over (batch, time).
    x5 = x.reshape(1, n, cin, h, w_sp)
    out5 = jax.block_until_ready(fwd(x5, params))
    assert out5.shape == (1, n, cout, 2 * h, 2 * w_sp), out5.shape
    max_err5 = float(jnp.max(jnp.abs(
        out5.reshape(out.shape).astype(jnp.float32) - out.astype(jnp.float32))))
    assert max_err5 == 0.0, max_err5

    print("KERNEL_OK")
</pallas_src>

<mosaic_0001>
module attributes {stable_mosaic.version = 11 : i64} {
  func.func @_upconv_kernel(%arg0: i32, %arg1: i32, %arg2: memref<1x1x8x432xbf16, #tpu.memory_space<vmem>>, %arg3: memref<32x72xbf16, #tpu.memory_space<vmem>>, %arg4: memref<32x1xf32, #tpu.memory_space<vmem>>, %arg5: memref<1x1x32x384xbf16, #tpu.memory_space<vmem>>) attributes {dimension_semantics = [#tpu.dimension_semantics<parallel>, #tpu.dimension_semantics<parallel>], iteration_bounds = array<i64: 2, 1>, scalar_prefetch = 0 : i64, scratch_operands = 0 : i64, tpu.core_type = #tpu.core_type<tc>, window_params = [{transform_indices = @transform_0, window_bounds = array<i64: 1, 1, 8, 432>}, {pipeline_mode = #tpu.pipeline_mode<synchronous>, transform_indices = @transform_1, window_bounds = array<i64: 32, 72>}, {pipeline_mode = #tpu.pipeline_mode<synchronous>, transform_indices = @transform_2, window_bounds = array<i64: 32, 1>}, {transform_indices = @transform_3, window_bounds = array<i64: 1, 1, 32, 384>}]} {
    %c0 = arith.constant 0 : index
    %c0_0 = arith.constant 0 : index
    %c0_1 = arith.constant 0 : index
    %c0_2 = arith.constant 0 : index
    %0 = vector.load %arg2[%c0, %c0_0, %c0_1, %c0_2] : memref<1x1x8x432xbf16, #tpu.memory_space<vmem>>, vector<1x1x8x432xbf16>
    %1 = vector.shape_cast %0 : vector<1x1x8x432xbf16> to vector<8x432xbf16>
    %2 = vector.extract_strided_slice %1 {offsets = [0, 0], sizes = [8, 384], strides = [1, 1]} : vector<8x432xbf16> to vector<8x384xbf16>
    %3 = vector.extract_strided_slice %1 {offsets = [0, 1], sizes = [8, 384], strides = [1, 1]} : vector<8x432xbf16> to vector<8x384xbf16>
    %4 = vector.extract_strided_slice %1 {offsets = [0, 2], sizes = [8, 384], strides = [1, 1]} : vector<8x432xbf16> to vector<8x384xbf16>
    %5 = vector.extract_strided_slice %1 {offsets = [0, 18], sizes = [8, 384], strides = [1, 1]} : vector<8x432xbf16> to vector<8x384xbf16>
    %6 = vector.extract_strided_slice %1 {offsets = [0, 19], sizes = [8, 384], strides = [1, 1]} : vector<8x432xbf16> to vector<8x384xbf16>
    %7 = vector.extract_strided_slice %1 {offsets = [0, 20], sizes = [8, 384], strides = [1, 1]} : vector<8x432xbf16> to vector<8x384xbf16>
    %8 = vector.extract_strided_slice %1 {offsets = [0, 36], sizes = [8, 384], strides = [1, 1]} : vector<8x432xbf16> to vector<8x384xbf16>
    %9 = vector.extract_strided_slice %1 {offsets = [0, 37], sizes = [8, 384], strides = [1, 1]} : vector<8x432xbf16> to vector<8x384xbf16>
    %10 = vector.extract_strided_slice %1 {offsets = [0, 38], sizes = [8, 384], strides = [1, 1]} : vector<8x432xbf16> to vector<8x384xbf16>
    %11 = tpu.concatenate %2, %3, %4, %5, %6, %7, %8, %9, %10 in 0 : vector<8x384xbf16>, vector<8x384xbf16>, vector<8x384xbf16>, vector<8x384xbf16>, vector<8x384xbf16>, vector<8x384xbf16>, vector<8x384xbf16>, vector<8x384xbf16>, vector<8x384xbf16> -> vector<72x384xbf16>
    %c0_3 = arith.constant 0 : index
    %c0_4 = arith.constant 0 : index
    %12 = vector.load %arg3[%c0_3, %c0_4] : memref<32x72xbf16, #tpu.memory_space<vmem>>, vector<32x72xbf16>
    %cst = arith.constant dense<0.000000e+00> : vector<32x384xf32>
    %13 = tpu.matmul %12, %11, %cst {dimension_numbers = #tpu.dot_dimension_numbers<[1], [0], [0], [1], [0, 0, 1, 1], [], []>} : vector<32x72xbf16>, vector<72x384xbf16>, vector<32x384xf32> -> vector<32x384xf32>
    %c0_5 = arith.constant 0 : index
    %c0_6 = arith.constant 0 : index
    %14 = vector.load %arg4[%c0_5, %c0_6] : memref<32x1xf32, #tpu.memory_space<vmem>>, vector<32x1xf32>
    %15 = vector.broadcast %14 : vector<32x1xf32> to vector<32x384xf32>
    %16 = arith.addf %13, %15 : vector<32x384xf32>
    %cst_7 = arith.constant 0.000000e+00 : f32
    %17 = vector.broadcast %cst_7 : f32 to vector<32x384xf32>
    %18 = arith.maximumf %16, %17 : vector<32x384xf32>
    %19 = arith.truncf %18 : vector<32x384xf32> to vector<32x384xbf16>
    %c0_8 = arith.constant 0 : index
    %c0_9 = arith.constant 0 : index
    %c0_10 = arith.constant 0 : index
    %c0_11 = arith.constant 0 : index
    %20 = vector.load %arg5[%c0_8, %c0_9, %c0_10, %c0_11] : memref<1x1x32x384xbf16, #tpu.memory_space<vmem>>, vector<1x1x32x384xbf16>
    %21 = vector.shape_cast %20 : vector<1x1x32x384xbf16> to vector<32x384xbf16>
    %22 = vector.shape_cast %19 : vector<32x384xbf16> to vector<1x1x32x384xbf16>
    tpu.vector_store %arg5[%c0_8, %c0_9, %c0_10, %c0_11], %22 {strides = array<i32>} : memref<1x1x32x384xbf16, #tpu.memory_space<vmem>>, vector<1x1x32x384xbf16>,
    return
  }
  func.func @transform_0(%arg0: i32, %arg1: i32) -> (i32, i32, i32, i32) {
    %c0_i32 = arith.constant 0 : i32
    %c0_i32_0 = arith.constant 0 : i32
    %c0_i32_1 = arith.constant 0 : i32
    return %arg0, %arg1, %c0_i32, %c0_i32_0 : i32, i32, i32, i32
  }
  func.func @transform_1(%arg0: i32, %arg1: i32) -> (i32, i32) {
    %c0_i32 = arith.constant 0 : i32
    %c0_i32_0 = arith.constant 0 : i32
    %c0_i32_1 = arith.constant 0 : i32
    return %c0_i32, %c0_i32_0 : i32, i32
  }
  func.func @transform_2(%arg0: i32, %arg1: i32) -> (i32, i32) {
    %c0_i32 = arith.constant 0 : i32
    %c0_i32_0 = arith.constant 0 : i32
    %c0_i32_1 = arith.constant 0 : i32
    return %c0_i32, %c0_i32_0 : i32, i32
  }
  func.func @transform_3(%arg0: i32, %arg1: i32) -> (i32, i32, i32, i32) {
    %c0_i32 = arith.constant 0 : i32
    %c0_i32_0 = arith.constant 0 : i32
    %c0_i32_1 = arith.constant 0 : i32
    return %arg0, %arg1, %c0_i32, %c0_i32_0 : i32, i32, i32, i32
  }
}

</mosaic_0001>

<bundles_post_ra>
// kernel: tile.8
= control target key start
LH: loop header
LB: loop body
LE: loop exit
PB: predicated region body
PF: predicated region fallthrough
CT: control target
= control target key end

     0   :  { %s22_s0 = inlined_call_operand.vmem [shape: f32[8], index: 0, kind: input, shape index: {}]   ;;  %s23_s1 = inlined_call_operand.vmem [shape: f32[4,8], index: 1, kind: output, shape index: {}]  }
   0x1   :  { %v4_v0 = vld [vmem:[%s22_s0] ss:$0 sm:$0xff] }
   0x2   :  { %5 = vst [vmem:[%s23_s1] sm:$0xf] %v4_v0 }

// kernel: tile.0
= control target key start
LH: loop header
LB: loop body
LE: loop exit
PB: predicated region body
PF: predicated region fallthrough
CT: control target
= control target key end

     0   :  { %s66_s8 = smov 125   ;;  %vm7_vm0 = vcmask 7168   ;;  %s67_s11 = smov 126   ;;  %s117_s0 = inlined_call_operand.vmem [shape: f32[4,8], index: 0, kind: input, shape index: {}]   ;;  %s118_s1 = inlined_call_operand.vmem [shape: f32[32,1], index: 1, kind: output, shape index: {}]  }
   0x1   :  { %v4_v0 = vld [vmem:[%s117_s0] sm:$0xf]  ;;  %s65_s0 = smov 127   ;;  %s68_s12 = smov 124  }
   0x2   :  { %5 = vst [vmem:[#allocation0] sm:$0xf] %v4_v0  ;;  %s69_s13 = smov 123   ;;  %s70_s14 = smov 122  }
   0x3   :  { %s71_s15 = smov 121  }
   0x9   :  { %v9_v1 = vld [vmem:[#allocation0] sm:$0xf]  }
   0xa   :  { %v21_v2 = vld [vmem:[#allocation0] sm:$0xf]   ;;  %10 = vrot.lane.b32.xlu0 %v9_v1, %s65_s0 }
   0xb   :  { %22 = vrot.lane.b32.xlu1 %v21_v2, %s66_s8  ;;  %v15_v3 = vld [vmem:[#allocation0] sm:$0xf]  }
   0xc   :  { %v27_v4 = vld [vmem:[#allocation0] sm:$0xf]  }
   0xd   :  { %v6_v5 = vld [vmem:[#allocation0] sm:$0xf]  }
   0xe   :  { %8 = vst.msk [vmem:[%s118_s1] ss:$8 sm:$0xf] %vm7_vm0, %v6_v5   ;;  %16 = vrot.lane.b32.xlu0 %v15_v3, %s67_s11  ;;  %v33_v6 = vld [vmem:[#allocation0] sm:$0xf]  }
   0xf   :  { %28 = vrot.lane.b32.xlu1 %v27_v4, %s68_s12  ;;  %v39_v7 = vld [vmem:[#allocation0] sm:$0xf]  }
  0x10   :  { %v45_v8 = vld [vmem:[#allocation0] sm:$0xf]  }
  0x12   :  { %34 = vrot.lane.b32.xlu0 %v33_v6, %s69_s13 }
  0x13   :  { %40 = vrot.lane.b32.xlu1 %v39_v7, %s70_s14 }
  0x16   :  { %46 = vrot.lane.b32.xlu0 %v45_v8, %s71_s15 }
  0x7c   :  { %v11_v9 = vpop.permute.xlu0 %10  }
  0x7d   :  { %v23_v10 = vpop.permute.xlu1 %22   ;;  %51 = vst.msk [vmem:[%s118_s1 + $0x1] ss:$8 sm:$0xf] %vm7_vm0, %v11_v9  }
  0x7e   :  { %53 = vst.msk [vmem:[%s118_s1 + $0x3] ss:$8 sm:$0xf] %vm7_vm0, %v23_v10  }
  0x80   :  { %v17_v11 = vpop.permute.xlu0 %16  }
  0x81   :  { %v29_v12 = vpop.permute.xlu1 %28   ;;  %52 = vst.msk [vmem:[%s118_s1 + $0x2] ss:$8 sm:$0xf] %vm7_vm0, %v17_v11  }
  0x82   :  { %54 = vst.msk [vmem:[%s118_s1 + $0x4] ss:$8 sm:$0xf] %vm7_vm0, %v29_v12  }
  0x84   :  { %v35_v13 = vpop.permute.xlu0 %34  }
  0x85   :  { %v41_v14 = vpop.permute.xlu1 %40   ;;  %55 = vst.msk [vmem:[%s118_s1 + $0x5] ss:$8 sm:$0xf] %vm7_vm0, %v35_v13  }
  0x86   :  { %56 = vst.msk [vmem:[%s118_s1 + $0x6] ss:$8 sm:$0xf] %vm7_vm0, %v41_v14  }
  0x88   :  { %v47_v15 = vpop.permute.xlu0 %46  }
  0x89   :  { %57 = vst.msk [vmem:[%s118_s1 + $0x7] ss:$8 sm:$0xf] %vm7_vm0, %v47_v15  }

// kernel: upconv_layer.1
= control target key start
LH: loop header
LB: loop body
LE: loop exit
PB: predicated region body
PF: predicated region fallthrough
CT: control target
= control target key end

     0   :  { %s828_s12 = smov 0   ;;  %s830_s13 = smov 0   ;;  %s978_s0 = inlined_call_operand.vmem [shape: bf16[2,1,8,432], index: 0, kind: input, shape index: {}]   ;;  %s979_s1 = inlined_call_operand.vmem [shape: bf16[32,72], index: 1, kind: input, shape index: {}]   ;;  %s980_s2 = inlined_call_operand.vmem [shape: f32[32,1], index: 2, kind: input, shape index: {}]   ;;  %s981_s3 = inlined_call_operand.vmem [shape: bf16[2,1,32,384], index: 3, kind: output, shape index: {}]  }
   0x1   :  { %s832_s14 = smov 0  }
   0x2 LB: > { %s25_s15 = sadd.s32 1, %s793_s13  ;;  %p677_p0 = scmp.ge.s32.totalorder %s797_s14, 1  ;;  %s797_s14 = sphi %s832_s14, %s13_s14   ;;  %s793_s13 = sphi %s830_s13, %s983_s13   ;;  %s789_s12 = sphi %s828_s12, %s982_s12  }
   0x3   : > { %p27_p1 = scmp.ge.s32.totalorder %s25_s15, 2  ;;  %p157_p2 = scmp.lt.s32.totalorder %s797_s14, 3 }
   0x5   : > { %s985_s15 = smov (%p27_p1, %s25_s15), 0  ;;  %p158_p3 = pnand %p677_p0, %p157_p2 }
   0x6   : > { %p189_p4 = scmp.lt.s32.totalorder (!%p158_p3), %s789_s12, 1  ;;  %s799_s20 = smov (!%p158_p3), 127   ;;  %v806_v6 = vmov (!%p158_p3), 0   ;;  %v883_v7 = vld [vmem:[%s979_s1] sm:$0xff] (!%p158_p3)   ;;  %vm403_vm0 = vcmask (!%p158_p3), 588800   ;;  %v370_v9 = vld [vmem:[%s980_s2 + $0x8] sm:$0xff] (!%p158_p3) }
   0x7   : > { %161 = sbr.rel (%p158_p3) target bundleno = 427 (0x1ab), region = 32  ;;  %s800_s21 = smov (!%p158_p3), 126   ;;  %451 = vmatprep.mubr.bf16.mxu0 (!%p158_p3), %v806_v6  ;;  %767 = vset.pattern.permute.xlu0 (!%p158_p3), %v806_v6  ;;  %v369_v8 = vld [vmem:[%s980_s2] sm:$0xff] (!%p158_p3)  ;;  %v372_v10 = vld [vmem:[%s980_s2 + $0x18] sm:$0xff] (!%p158_p3)  ;;  %v371_v11 = vld [vmem:[%s980_s2 + $0x10] sm:$0xff] (!%p158_p3)  ;;  %vm228_vm1 = vcmask (!%p158_p3), 1039360  }
   0x8   : > { %s801_s22 = smov (!%p158_p3), 110   ;;  %s802_s23 = smov (!%p158_p3), 109   ;;  %728 = vmatprep.mubr.msk.bf16.mxu1 (!%p158_p3), %vm403_vm0, %v883_v7  ;;  %768 = vset.pattern.permute.xlu1 (!%p158_p3), %v806_v6  ;;  %vm316_vm2 = vcmask (!%p158_p3), 1043456   ;;  %vm240_vm3 = vcmask (!%p158_p3), 1031168   ;;  %vm252_vm4 = vcmask (!%p158_p3), 900096   ;;  %vm264_vm5 = vcmask (!%p158_p3), 891904  }
   0x9   : > { %s803_s24 = smov (!%p158_p3), 108   ;;  %s804_s25 = smov (!%p158_p3), 92   ;;  %vm276_vm6 = vcmask (!%p158_p3), 883712   ;;  %vm288_vm7 = vcmask (!%p158_p3), 752640   ;;  %vm300_vm8 = vcmask (!%p158_p3), 744448   ;;  %vm312_vm9 = vcmask (!%p158_p3), 736256  }
   0xa   : > { %s805_s26 = smov (!%p158_p3), 91   ;;  %s807_s29 = smov (!%p158_p3), 90  }
   0xe   : > { %s987_s12 = smov (!%p189_p4, %s789_s12), 1 }
   0xf   : > { %s702_s16 = sshll.u32 %s987_s12, 4  ;;  %s733_s17 = smul.u32 48, %s987_s12 }
  0x10   : > { %s197_s19 = scalar_lea.vmem %s978_s0, %s702_s16 }
  0x11   : > { %v208_v0 = vld [vmem:[%s197_s19] sm:$0xff]  ;;  %v209_v1 = vld [vmem:[%s197_s19 + $0x8] sm:$0xff] }
  0x12   : > { %v852_v2 = vcombine.high %v208_v0, %v208_v0  ;;  %v854_v3 = vcombine.low %v208_v0, %v208_v0  ;;  %v858_v4 = vcombine.low %v209_v1, %v209_v1  ;;  %v684_v5 = vcombine.high %v209_v1, %v209_v1 }
  0x14   : > { %222 = vrot.lane.b32.xlu0 %v852_v2, %s799_s20  ;;  %220 = vrot.lane.b32.xlu1 %v854_v3, %s799_s20 }
  0x18   : > { %224 = vrot.lane.b32.xlu0 %v858_v4, %s799_s20  ;;  %234 = vrot.lane.b32.xlu1 %v852_v2, %s800_s21 }
  0x1c   : > { %236 = vrot.lane.b32.xlu0 %v858_v4, %s800_s21  ;;  %246 = vrot.lane.b32.xlu1 %v852_v2, %s801_s22 }
  0x20   : > { %248 = vrot.lane.b32.xlu0 %v858_v4, %s801_s22  ;;  %232 = vrot.lane.b32.xlu1 %v854_v3, %s800_s21 }
  0x24   : > { %244 = vrot.lane.b32.xlu0 %v854_v3, %s801_s22  ;;  %226 = vrot.lane.b32.xlu1 %v684_v5, %s799_s20  ;;  %s959_s20 = scalar_lea.vmem %s981_s3, %s733_s17 }
  0x28   : > { %258 = vrot.lane.b32.xlu0 %v852_v2, %s802_s23  ;;  %260 = vrot.lane.b32.xlu1 %v858_v4, %s802_s23 }
  0x2c   : > { %270 = vrot.lane.b32.xlu0 %v852_v2, %s803_s24  ;;  %272 = vrot.lane.b32.xlu1 %v858_v4, %s803_s24 }
  0x30   : > { %256 = vrot.lane.b32.xlu0 %v854_v3, %s802_s23  ;;  %268 = vrot.lane.b32.xlu1 %v854_v3, %s803_s24 }
  0x34   : > { %238 = vrot.lane.b32.xlu0 %v684_v5, %s800_s21  ;;  %250 = vrot.lane.b32.xlu1 %v684_v5, %s801_s22 }
  0x38   : > { %282 = vrot.lane.b32.xlu0 %v852_v2, %s804_s25  ;;  %284 = vrot.lane.b32.xlu1 %v858_v4, %s804_s25 }
  0x3c   : > { %294 = vrot.lane.b32.xlu0 %v852_v2, %s805_s26  ;;  %296 = vrot.lane.b32.xlu1 %v858_v4, %s805_s26 }
  0x40   : > { %280 = vrot.lane.b32.xlu0 %v854_v3, %s804_s25  ;;  %292 = vrot.lane.b32.xlu1 %v854_v3, %s805_s26 }
  0x44   : > { %262 = vrot.lane.b32.xlu0 %v684_v5, %s802_s23  ;;  %274 = vrot.lane.b32.xlu1 %v684_v5, %s803_s24 }
  0x48   : > { %304 = vrot.lane.b32.xlu0 %v854_v3, %s807_s29  ;;  %306 = vrot.lane.b32.xlu1 %v852_v2, %s807_s29 }
  0x4c   : > { %308 = vrot.lane.b32.xlu0 %v858_v4, %s807_s29  ;;  %286 = vrot.lane.b32.xlu1 %v684_v5, %s804_s25 }
  0x50   : > { %298 = vrot.lane.b32.xlu0 %v684_v5, %s805_s26  ;;  %310 = vrot.lane.b32.xlu1 %v684_v5, %s807_s29 }
  0x54   : > { %375 = vperm.xlu0 %767, %v369_v8   ;;  %380 = vperm.xlu1 %768, %v370_v9  }
  0x58   : > { %390 = vperm.xlu0 %767, %v372_v10   ;;  %385 = vperm.xlu1 %768, %v371_v11  }
  0x86   : > { %v223_v12 = vpop.permute.xlu0 %222  ;;  %v221_v13 = vpop.permute.xlu1 %220 }
  0x87   : > { %v229_v14 = vsel %vm228_vm1, %v221_v13, %v223_v12 }
  0x88   : > { %v319_v19 = vsel %vm316_vm2, %v854_v3, %v229_v14 }
  0x8a   : > { %v225_v15 = vpop.permute.xlu0 %224  ;;  %v235_v16 = vpop.permute.xlu1 %234 }
  0x8b   : > { %v230_v17 = vsel %vm228_vm1, %v223_v12, %v225_v15 }
  0x8c   : > { %v323_v18 = vsel %vm316_vm2, %v852_v2, %v230_v17 }
  0x8d   : > { %419 = vmatprep.subr.bf16.mxu0 %v323_v18 }
  0x8e   : > { %v237_v20 = vpop.permute.xlu0 %236  ;;  %420 = vmatpush1.bf16.msra.mxu0 %v319_v19  ;;  %v247_v21 = vpop.permute.xlu1 %246  ;;  %v774_v19 = vld [vmem:[%s979_s1 + $0x8] sm:$0xff]  }
  0x8f   : > { %v242_v24 = vsel %vm240_vm3, %v235_v16, %v237_v20 }
  0x92   : > { %v249_v22 = vpop.permute.xlu0 %248  ;;  %v233_v23 = vpop.permute.xlu1 %232 }
  0x93   : > { %v254_v25 = vsel %vm252_vm4, %v247_v21, %v249_v22  ;;  %v241_v29 = vsel %vm240_vm3, %v233_v23, %v235_v16 }
  0x94   : > { %v335_v26 = vsel %vm316_vm2, %v242_v24, %v254_v25 }
  0x95   : > { %421 = vmatprep.subr.bf16.mxu0 %v335_v26 }
  0x96   : > { %v245_v27 = vpop.permute.xlu0 %244  ;;  %v227_v28 = vpop.permute.xlu1 %226 }
  0x97   : > { %v253_v30 = vsel %vm252_vm4, %v245_v27, %v247_v21  ;;  %v231_v31 = vsel %vm228_vm1, %v225_v15, %v227_v28 }
  0x98   : > { %v331_v32 = vsel %vm316_vm2, %v241_v29, %v253_v30  ;;  %v327_v33 = vsel %vm316_vm2, %v858_v4, %v231_v31 }
  0x99   : > { %422 = vmatpush1.bf16.msra.mxu0 %v331_v32  ;;  %718 = vmatprep.subr.bf16.mxu1 %v327_v33 }
  0x9a   : > { %v259_v34 = vpop.permute.xlu0 %258  ;;  %719 = vmatpush3.bf16.msra.mxu1 %v327_v33  ;;  %v261_v35 = vpop.permute.xlu1 %260 }
  0x9b   : > { %v266_v38 = vsel %vm264_vm5, %v259_v34, %v261_v35 }
  0x9e   : > { %v271_v36 = vpop.permute.xlu0 %270  ;;  %v273_v37 = vpop.permute.xlu1 %272 }
  0x9f   : > { %v278_v39 = vsel %vm276_vm6, %v271_v36, %v273_v37 }
  0xa0   : > { %v347_v40 = vsel %vm316_vm2, %v266_v38, %v278_v39 }
  0xa1   : > { %423 = vmatprep.subr.bf16.mxu0 %v347_v40 }
  0xa2   : > { %v257_v41 = vpop.permute.xlu0 %256  ;;  %v269_v42 = vpop.permute.xlu1 %268 }
  0xa3   : > { %v265_v43 = vsel %vm264_vm5, %v257_v41, %v259_v34  ;;  %v277_v44 = vsel %vm276_vm6, %v269_v42, %v271_v36 }
  0xa4   : > { %v343_v45 = vsel %vm316_vm2, %v265_v43, %v277_v44 }
  0xa5   : > { %424 = vmatpush1.bf16.msra.mxu0 %v343_v45 }
  0xa6   : > { %v239_v46 = vpop.permute.xlu0 %238  ;;  %v251_v47 = vpop.permute.xlu1 %250 }
  0xa7   : > { %v243_v48 = vsel %vm240_vm3, %v237_v20, %v239_v46  ;;  %v255_v49 = vsel %vm252_vm4, %v249_v22, %v251_v47 }
  0xa8   : > { %v339_v50 = vsel %vm316_vm2, %v243_v48, %v255_v49 }
  0xa9   : > { %720 = vmatprep.subr.bf16.mxu1 %v339_v50 }
  0xaa   : > { %v283_v51 = vpop.permute.xlu0 %282  ;;  %721 = vmatpush3.bf16.msra.mxu1 %v339_v50  ;;  %v285_v52 = vpop.permute.xlu1 %284 }
  0xab   : > { %v290_v55 = vsel %vm288_vm7, %v283_v51, %v285_v52 }
  0xae   : > { %v295_v53 = vpop.permute.xlu0 %294  ;;  %v297_v54 = vpop.permute.xlu1 %296 }
  0xaf   : > { %v302_v56 = vsel %vm300_vm8, %v295_v53, %v297_v54 }
  0xb0   : > { %v359_v57 = vsel %vm316_vm2, %v290_v55, %v302_v56 }
  0xb1   : > { %425 = vmatprep.subr.bf16.mxu0 %v359_v57 }
  0xb2   : > { %v281_v58 = vpop.permute.xlu0 %280  ;;  %v293_v59 = vpop.permute.xlu1 %292 }
  0xb3   : > { %v289_v60 = vsel %vm288_vm7, %v281_v58, %v283_v51  ;;  %v301_v61 = vsel %vm300_vm8, %v293_v59, %v295_v53 }
  0xb4   : > { %v355_v62 = vsel %vm316_vm2, %v289_v60, %v301_v61 }
  0xb5   : > { %426 = vmatpush1.bf16.msra.mxu0 %v355_v62 }
  0xb6   : > { %v263_v63 = vpop.permute.xlu0 %262  ;;  %v275_v0 = vpop.permute.xlu1 %274 }
  0xb7   : > { %v267_v1 = vsel %vm264_vm5, %v261_v35, %v263_v63  ;;  %v279_v2 = vsel %vm276_vm6, %v273_v37, %v275_v0 }
  0xb8   : > { %v351_v3 = vsel %vm316_vm2, %v267_v1, %v279_v2 }
  0xb9   : > { %722 = vmatprep.subr.bf16.mxu1 %v351_v3 }
  0xba   : > { %v305_v4 = vpop.permute.xlu0 %304  ;;  %723 = vmatpush3.bf16.msra.mxu1 %v351_v3  ;;  %v307_v5 = vpop.permute.xlu1 %306 }
  0xbb   : > { %v313_v8 = vsel %vm312_vm9, %v305_v4, %v307_v5 }
  0xbc   : > { %v411_v12 = vsel %vm316_vm2, %v313_v8, 0 }
  0xbe   : > { %v309_v9 = vpop.permute.xlu0 %308  ;;  %v287_v10 = vpop.permute.xlu1 %286 }
  0xbf   : > { %v314_v11 = vsel %vm312_vm9, %v307_v5, %v309_v9  ;;  %v291_v14 = vsel %vm288_vm7, %v285_v52, %v287_v10 }
  0xc0   : > { %687 = vmatprep.subr.msk.bf16.mxu0 %vm316_vm2, %v314_v11 }
  0xc1   : > { %428 = vmatpush1.bf16.msra.mxu0 %v411_v12 }
  0xc2   : > { %v299_v13 = vpop.permute.xlu0 %298  ;;  %v311_v16 = vpop.permute.xlu1 %310 }
  0xc3   : > { %v303_v15 = vsel %vm300_vm8, %v297_v54, %v299_v13  ;;  %v315_v18 = vsel %vm312_vm9, %v309_v9, %v311_v16 }
  0xc4   : > { %688 = vmatmul.mubr.msk.bf16.vlgmr.msra.gmra.mrb[0].mxu0 %vm403_vm0, %v883_v7  ;;  %v363_v17 = vsel %vm316_vm2, %v291_v14, %v303_v15  ;;  %v417_v20 = vsel %vm316_vm2, %v315_v18, 0 }
  0xc5   : > { %724 = vmatprep.subr.bf16.mxu1 %v363_v17  ;;  %461 = vmatprep.mubr.bf16.mxu0 %v806_v6 }
  0xc6   : > { %725 = vmatpush3.bf16.msra.mxu1 %v363_v17 }
  0xc7   : > { %732 = vmatprep.subr.msk.bf16.mxu1 %vm316_vm2, %v315_v18 }
  0xca   : > { %727 = vmatpush3.bf16.msra.mxu1 %v417_v20 }
  0xcc   : > { %689 = vmatmul.mubr.msk.bf16.gmra.mrb[4].mxu0 %vm403_vm0, %v774_v19 }
  0xcd   : > { %729 = vmatmul.mubr.msk.bf16.vlgmr.msra.gmra.mrb[0].mxu1 %vm403_vm0, %v774_v19 }
  0xd3   : > { %v376_v7 = vpop.permute.xlu0 %375  ;;  %v381_v22 = vpop.permute.xlu1 %380 }
  0xd7   : > { %v386_v34 = vpop.permute.xlu1 %385  ;;  %v391_v36 = vpop.permute.xlu0 %390 }
 0x197   : > { %v453_v21 = vpop.f32.mrb[0].mxu0 }
 0x198   : > { %v454_v6 = vadd.f32 %v453_v21, %v376_v7  ;;  %v455_v23 = vpop.f32.mrb[1].mxu0 }
 0x199   : > { %v456_v24 = vadd.f32 %v455_v23, %v376_v7  ;;  %v457_v25 = vpop.f32.mrb[2].mxu0 }
 0x19a   : > { %v521_v26 = vmax.f32 %v454_v6, 0.0  ;;  %v458_v27 = vadd.f32 %v457_v25, %v381_v22  ;;  %v459_v28 = vpop.f32.mrb[3].mxu0 }
 0x19b   : > { %v522_v29 = vmax.f32 %v456_v24, 0.0  ;;  %v460_v30 = vadd.f32 %v459_v28, %v381_v22 }
 0x19c   : > { %v524_v31 = vmax.f32 %v458_v27, 0.0 }
 0x19d   : > { %v703_v32 = vpack.c.bf16 %v522_v29, %v521_v26  ;;  %v525_v33 = vmax.f32 %v460_v30, 0.0 }
 0x19f   : > { %573 = vst [vmem:[%s959_s20] sm:$0xff] %v703_v32  ;;  %v705_v35 = vpack.c.bf16 %v525_v33, %v524_v31  ;;  %v463_v37 = vpop.f32.mrb[4].mxu0 }
 0x1a0   : > { %v464_v38 = vadd.f32 %v463_v37, %v386_v34  ;;  %v465_v39 = vpop.f32.mrb[5].mxu0  ;;  %v730_v40 = vpop.f32.mrb[0].mxu1 }
 0x1a1   : > { %575 = vst [vmem:[%s959_s20 + $0xc] sm:$0xff] %v705_v35  ;;  %v466_v41 = vadd.f32 %v465_v39, %v386_v34  ;;  %v515_v42 = vadd.f32 %v730_v40, %v386_v34  ;;  %v467_v43 = vpop.f32.mrb[6].mxu0  ;;  %v506_v44 = vpop.f32.mrb[1].mxu1 }
 0x1a2   : > { %v527_v45 = vmax.f32 %v464_v38, 0.0  ;;  %v468_v46 = vadd.f32 %v467_v43, %v391_v36  ;;  %v507_v47 = vadd.f32 %v506_v44, %v376_v7  ;;  %v469_v48 = vpop.f32.mrb[7].mxu0  ;;  %v731_v49 = vpop.f32.mrb[2].mxu1 }
 0x1a3   : > { %v528_v50 = vmax.f32 %v466_v41, 0.0  ;;  %v529_v51 = vmax.f32 %v515_v42, 0.0  ;;  %v470_v52 = vadd.f32 %v469_v48, %v391_v36  ;;  %v518_v53 = vadd.f32 %v731_v49, %v391_v36  ;;  %v509_v54 = vpop.f32.mrb[3].mxu1 }
 0x1a4   : > { %v530_v55 = vmax.f32 %v468_v46, 0.0  ;;  %v523_v56 = vmax.f32 %v507_v47, 0.0  ;;  %v510_v57 = vadd.f32 %v509_v54, %v381_v22 }
 0x1a5   : > { %v707_v58 = vpack.c.bf16 %v528_v50, %v527_v45  ;;  %v708_v59 = vpack.c.bf16 %v529_v51, %v529_v51  ;;  %v531_v60 = vmax.f32 %v470_v52, 0.0  ;;  %v532_v61 = vmax.f32 %v518_v53, 0.0 }
 0x1a6   : > { %v704_v62 = vpack.c.bf16 %v523_v56, %v523_v56  ;;  %v526_v63 = vmax.f32 %v510_v57, 0.0 }
 0x1a7   : > { %577 = vst [vmem:[%s959_s20 + $0x18] sm:$0xff] %v707_v58  ;;  %578 = vst [vmem:[%s959_s20 + $0x20] sm:$0xf] %v708_v59  ;;  %v709_v0 = vpack.c.bf16 %v531_v60, %v530_v55  ;;  %v710_v1 = vpack.c.bf16 %v532_v61, %v532_v61 }
 0x1a8   : > { %574 = vst [vmem:[%s959_s20 + $0x8] sm:$0xf] %v704_v62  ;;  %v706_v2 = vpack.c.bf16 %v526_v63, %v526_v63 }
 0x1a9   : > { %579 = vst [vmem:[%s959_s20 + $0x24] sm:$0xff] %v709_v0  ;;  %580 = vst [vmem:[%s959_s20 + $0x2c] sm:$0xf] %v710_v1 }
 0x1aa   : > { %576 = vst [vmem:[%s959_s20 + $0x14] sm:$0xf] %v706_v2 }
 0x1ab PF: > { %s13_s14 = sadd.s32 1, %s797_s14   ;;  %s982_s12 = smov %s793_s13 }
 0x1ac   : > { %p10_p5 = scmp.ge.s32.totalorder %s13_s14, 4   ;;  %s983_s13 = smov %s985_s15 }
 0x1ae   :  { %12 = sbr.rel (!%p10_p5) target bundleno = 2 (0x2), region = 62 }

</bundles_post_ra>
